<compile_context>
chip_gen: v6e
topology: v6e:2x2x1
jax: 0.10.0
libtpu: 0.0.40
codegen_flags: <defaults>
</compile_context>

<pallas_src>
import functools

import numpy as np
import jax
import jax.numpy as jnp
from jax.experimental import pallas as pl
from jax.experimental.pallas import tpu as pltpu


# ----------------------------- Pallas kernel -------------------------------

def _dequant_kernel(bits_ref, w_ref, out_ref, *, bias):
    # bits_ref: (tb, bw) in the caller's dtype (f32 / bf16 / int8).  Cast to bf16
    # on the VPU (free: this kernel is HBM-bound, VALU slots are idle) right
    # before the MXU matmul; accumulate in f32.
    bits = bits_ref[...].astype(jnp.bfloat16)
    num = jnp.dot(bits, w_ref[...], preferred_element_type=jnp.float32)
    # W already carries the 1/2**B scale; bias = 0.5 / 2**B is a compile-time const.
    out_ref[...] = num + bias


# ----------------------------- helpers --------------------------------------

_VMEM_BUDGET = 12 * 1024 * 1024   # conservative vs 32 MiB scoped (64 MiB total on v7x)


def _round_up(x, m):
    return ((x + m - 1) // m) * m


def _unpack_matrix(rows, cols, B):
    # Host-side numpy constant:  W[c, k] = 2**(-1 - c % B) if c // B == k else 0.
    # The 1/2**B output scale is folded in; padded columns (k >= rows // B) stay 0.
    c = np.arange(rows)
    k = np.arange(cols)
    vals = np.exp2(-1.0 - (c % B).astype(np.float64))
    w = np.where((c[:, None] // B) == k[None, :], vals[:, None], 0.0)
    return jnp.asarray(w, dtype=jnp.bfloat16)   # powers of two: exact in bf16


def _pick_batch_tile(batch, cap, col_tiles):
    """Largest divisor of `batch` that is a multiple of 16 (or 8) and <= cap.

    Prefers a grid with >= 2 total steps (so the "parallel" axes shard across
    both TensorCores on v7x).  Falls back to the full batch as a single block
    (allowed by the (8,128) rule) -- never pads, so no extra HBM relayout pass.
    """
    cap = max(8, min(cap, batch))
    for align in (16, 8):
        if batch % align != 0:
            continue
        divs = [d for d in range(align, cap + 1, align) if batch % d == 0]
        if not divs:
            divs = [align]
        if col_tiles < 2:
            multi = [d for d in divs if batch // d >= 2]
            if multi:
                return max(multi)
        return max(divs)
    return batch


# ----------------------------- wrapper ---------------------------------------

def dequantization_layer(bits, B):
    """Forward pass of DequantizationLayer(B) on a (batch, feedback_bits) bit tensor."""
    if bits.dtype == jnp.bool_:
        bits = bits.astype(jnp.int8)          # keep input HBM bytes minimal
    batch, nb = bits.shape
    assert nb % B == 0, "feedback_bits must be divisible by B"
    n = nb // B

    if n % 128 == 0:
        # Block-diagonal column tiling: one shared (tn*B, tn) W block for all
        # column tiles; lane-dense output, no post-slice needed.
        tn = 128
        while n % (tn * 2) == 0 and tn * 2 <= 512:
            tn *= 2
        ct, ow, bw = n // tn, tn, tn * B
    else:
        # Dense fallback: keep the output lane-dense by zero-padding W columns
        # (avoids masked vst.msk partial stores); slice the pad off afterwards.
        ct, ow, bw = 1, _round_up(n, 128), nb

    w = _unpack_matrix(bw, ow, B)
    bias = float(0.5 / (2 ** B))

    # VMEM-budgeted batch tile (double-buffered input + output blocks, resident W).
    per_row = 2 * bw * bits.dtype.itemsize + 2 * ow * 4
    cap = int((_VMEM_BUDGET - bw * ow * 2) // max(per_row, 1))
    tb = _pick_batch_tile(batch, max(16, min(cap, 1024)), ct)
    bt = batch // tb

    kernel = functools.partial(_dequant_kernel, bias=bias)
    out = pl.pallas_call(
        kernel,
        out_shape=jax.ShapeDtypeStruct((batch, ct * ow), jnp.float32),
        grid=(bt, ct),
        in_specs=[
            pl.BlockSpec((tb, bw), lambda i, j: (i, j)),   # bit rows / column groups
            pl.BlockSpec((bw, ow), lambda i, j: (0, 0)),   # constant unpack block
        ],
        out_specs=pl.BlockSpec((tb, ow), lambda i, j: (i, j)),
        compiler_params=pltpu.CompilerParams(
            dimension_semantics=("parallel", "parallel")),  # megacore sharding on v7x
    )(bits, w)

    return out if ct * ow == n else out[:, :n]


# --------------------------------- main --------------------------------------

if __name__ == "__main__":
    # TODO(synk): only the forward pass is implemented; the custom straight-through
    # backward of Dequantization.backward is out of scope here.
    B = 2
    FEEDBACK_BITS = 256
    BATCH = 8

    key = jax.random.PRNGKey(0)
    bits = jax.random.bernoulli(key, 0.5, (BATCH, FEEDBACK_BITS)).astype(jnp.float32)

    fwd = jax.jit(functools.partial(dequantization_layer, B=B))
    out = jax.block_until_ready(fwd(bits))

    # Pure-JAX reference mirroring Bit2Num + (num + 0.5) / 2**B
    ref_bits = bits.reshape(BATCH, FEEDBACK_BITS // B, B)
    weights = 2.0 ** (B - 1 - jnp.arange(B, dtype=jnp.float32))
    ref = (jnp.sum(ref_bits * weights, axis=-1) + 0.5) / float(2 ** B)

    assert out.shape == (BATCH, FEEDBACK_BITS // B), out.shape
    assert out.dtype == jnp.float32
    assert bool(jnp.allclose(out, ref, atol=1e-6, rtol=0)), "mismatch vs reference"
    # dequantized values must lie strictly inside (0, 1)
    assert bool(jnp.all((out > 0.0) & (out < 1.0)))
    print("KERNEL_OK")
</pallas_src>

<mosaic_0001>
module attributes {stable_mosaic.version = 11 : i64} {
  func.func @_dequant_kernel(%arg0: i32, %arg1: i32, %arg2: memref<8x256xf32, #tpu.memory_space<vmem>>, %arg3: memref<256x128xbf16, #tpu.memory_space<vmem>>, %arg4: memref<8x128xf32, #tpu.memory_space<vmem>>) attributes {dimension_semantics = [#tpu.dimension_semantics<parallel>, #tpu.dimension_semantics<parallel>], iteration_bounds = array<i64: 1, 1>, scalar_prefetch = 0 : i64, scratch_operands = 0 : i64, tpu.core_type = #tpu.core_type<tc>, window_params = [{transform_indices = @transform_0, window_bounds = array<i64: 8, 256>}, {pipeline_mode = #tpu.pipeline_mode<synchronous>, transform_indices = @transform_1, window_bounds = array<i64: 256, 128>}, {transform_indices = @transform_2, window_bounds = array<i64: 8, 128>}]} {
    %c0 = arith.constant 0 : index
    %c0_0 = arith.constant 0 : index
    %0 = vector.load %arg2[%c0, %c0_0] : memref<8x256xf32, #tpu.memory_space<vmem>>, vector<8x256xf32>
    %1 = arith.truncf %0 : vector<8x256xf32> to vector<8x256xbf16>
    %c0_1 = arith.constant 0 : index
    %c0_2 = arith.constant 0 : index
    %2 = vector.load %arg3[%c0_1, %c0_2] : memref<256x128xbf16, #tpu.memory_space<vmem>>, vector<256x128xbf16>
    %cst = arith.constant dense<0.000000e+00> : vector<8x128xf32>
    %3 = tpu.matmul %1, %2, %cst {dimension_numbers = #tpu.dot_dimension_numbers<[1], [0], [0], [1], [0, 0, 1, 1], [], []>} : vector<8x256xbf16>, vector<256x128xbf16>, vector<8x128xf32> -> vector<8x128xf32>
    %cst_3 = arith.constant 1.250000e-01 : f32
    %4 = vector.broadcast %cst_3 : f32 to vector<8x128xf32>
    %5 = arith.addf %3, %4 : vector<8x128xf32>
    %c0_4 = arith.constant 0 : index
    %c0_5 = arith.constant 0 : index
    %6 = vector.load %arg4[%c0_4, %c0_5] : memref<8x128xf32, #tpu.memory_space<vmem>>, vector<8x128xf32>
    tpu.vector_store %arg4[%c0_4, %c0_5], %5 {strides = array<i32>} : memref<8x128xf32, #tpu.memory_space<vmem>>, vector<8x128xf32>,
    return
  }
  func.func @transform_0(%arg0: i32, %arg1: i32) -> (i32, i32) {
    %c0_i32 = arith.constant 0 : i32
    return %arg0, %arg1 : i32, i32
  }
  func.func @transform_1(%arg0: i32, %arg1: i32) -> (i32, i32) {
    %c0_i32 = arith.constant 0 : i32
    %c0_i32_0 = arith.constant 0 : i32
    %c0_i32_1 = arith.constant 0 : i32
    return %c0_i32, %c0_i32_0 : i32, i32
  }
  func.func @transform_2(%arg0: i32, %arg1: i32) -> (i32, i32) {
    %c0_i32 = arith.constant 0 : i32
    return %arg0, %arg1 : i32, i32
  }
}

</mosaic_0001>

<bundles_post_ra>
// kernel: dequantization_layer.1
= control target key start
LH: loop header
LB: loop body
LE: loop exit
PB: predicated region body
PF: predicated region fallthrough
CT: control target
= control target key end

     0   :  { %7 = vsyncpa [#allocation3], 0  ;;  %s382_s0 = inlined_call_operand.hbm [shape: f32[8,256], index: 0, kind: input, shape index: {}]   ;;  %s383_s1 = inlined_call_operand.hbm [shape: bf16[256,128], index: 1, kind: input, shape index: {}]   ;;  %s384_s2 = inlined_call_operand.hbm [shape: f32[8,128], index: 2, kind: output, shape index: {}]  }
   0x1   :  { %8 = vsyncpa [#allocation6], 0 }
   0x2   :  { %9 = vsyncpa [#allocation4], 0  ;;  %s353_s9 = smov [#allocation2]   ;;  %s354_s11 = smov [#allocation5]  }
   0x3   :  { %s16_s10 = sshll.u32 %s353_s9, 4  ;;  %s25_s12 = sshll.u32 %s354_s11, 4  ;;  %s17_s10 = int_to_ptr.vmem [resolvable:$true] %s16_s10  ;;  %s26_s12 = int_to_ptr.vmem [resolvable:$true] %s25_s12 }
   0x4   :  { %s295_s13 = scalar_lea.vmem %s17_s10, 256  ;;  %p300_p1 = scmp.lt.s32.totalorder %s17_s10, %s17_s10 }
   0x5   :  { %p296_p0 = scmp.ne.s32.totalorder %s17_s10, %s295_s13  ;;  %p301_p2 = scmp.lt.s32.totalorder %s295_s13, %s295_s13 }
   0x7   :  { %p302_p3 = por %p301_p2, %p300_p1 }
   0x9   :  { %p303_p4 = pnand %p302_p3, %p296_p0 }
   0xb   :  { %306 = shalt.err (!%p303_p4)
}
   0xc   :  { %19 = dma.hbm_to_vmem [thread:$0]  %s382_s0, 256, %s17_s10, [#allocation3]  }
   0xd   :  { %s315_s16 = scalar_lea.vmem %s26_s12, 2048  ;;  %p320_p6 = scmp.lt.s32.totalorder %s26_s12, %s26_s12 }
   0xe   :  { %p316_p5 = scmp.ne.s32.totalorder %s26_s12, %s315_s16  ;;  %p321_p7 = scmp.lt.s32.totalorder %s315_s16, %s315_s16 }
  0x10   :  { %p322_p8 = por %p321_p7, %p320_p6 }
  0x12   :  { %p323_p9 = pnand %p322_p8, %p316_p5 }
  0x14   :  { %326 = shalt.err (!%p323_p9)
}
  0x15   :  { %s355_s17 = smov 64   ;;  %s356_s18 = smov 4  }
  0x16   :  { %31 = dma.hbm_to_vmem [thread:$0]  %s383_s1, 2048, %s26_s12, [#allocation6], %s355_s17, %s355_s17, %s356_s18  }
  0x17   :  { %347 = dma.done.wait [#allocation3], 256  }
  0x18   :  { %348 = vsyncadd [#allocation3], 4294967040 }
  0x19   :  { %349 = dma.done.wait [#allocation6], 2048  }
  0x1a   :  { %350 = vsyncadd [#allocation6], 4294965248  ;;  %v271_v0 = vld [vmem:[#allocation5 + $0x78] sm:$0xff]   ;;  %v273_v2 = vld [vmem:[#allocation5 + $0x70] sm:$0xff]   ;;  %s357_s0 = smov [#allocation7]  }
  0x1b   :  { %v272_v1 = vld [vmem:[#allocation5 + $0x38] sm:$0xff]   ;;  %244 = vmatprep.subr.bf16.mxu0 %v271_v0  ;;  %v274_v3 = vld [vmem:[#allocation5 + $0x30] sm:$0xff]   ;;  %v275_v4 = vld [vmem:[#allocation5 + $0x68] sm:$0xff]   ;;  %s218_s1 = sshll.u32 %s357_s0, 4  ;;  %s219_s1 = int_to_ptr.vmem [resolvable:$true] %s218_s1 }
  0x1c   :  { %245 = vmatpush3.bf16.msra.mxu0 %v272_v1  ;;  %v276_v5 = vld [vmem:[#allocation5 + $0x28] sm:$0xff]   ;;  %v277_v6 = vld [vmem:[#allocation5 + $0x60] sm:$0xff]   ;;  %v279_v8 = vld [vmem:[#allocation5 + $0x58] sm:$0xff]   ;;  %s327_s21 = scalar_lea.vmem %s219_s1, 128  ;;  %p332_p11 = scmp.lt.s32.totalorder %s219_s1, %s219_s1 }
  0x1d   :  { %246 = vmatprep.subr.bf16.mxu0 %v273_v2  ;;  %v278_v7 = vld [vmem:[#allocation5 + $0x20] sm:$0xff]   ;;  %v280_v9 = vld [vmem:[#allocation5 + $0x18] sm:$0xff]   ;;  %v281_v10 = vld [vmem:[#allocation5 + $0x50] sm:$0xff]   ;;  %p328_p10 = scmp.ne.s32.totalorder %s219_s1, %s327_s21  ;;  %p333_p12 = scmp.lt.s32.totalorder %s327_s21, %s327_s21 }
  0x1e   :  { %v40_v11 = vld [vmem:[#allocation2 + $0x8] sm:$0xff]  ;;  %v282_v13 = vld [vmem:[#allocation5 + $0x10] sm:$0xff]   ;;  %v283_v14 = vld [vmem:[#allocation5 + $0x48] sm:$0xff]  }
  0x1f   :  { %v42_v12 = vpack.c.bf16 %v40_v11, %v40_v11  ;;  %v284_v15 = vld [vmem:[#allocation5 + $0x8] sm:$0xff]   ;;  %v285_v16 = vld [vmem:[#allocation5 + $0x40] sm:$0xff]   ;;  %v39_v18 = vld [vmem:[#allocation2] sm:$0xff]  ;;  %p334_p13 = por %p333_p12, %p332_p11 }
  0x20   :  { %247 = vmatpush3.bf16.msra.mxu0 %v274_v3  ;;  %v286_v17 = vld [vmem:[#allocation5] sm:$0xff]   ;;  %v41_v19 = vpack.c.bf16 %v39_v18, %v39_v18 }
  0x21   :  { %248 = vmatprep.subr.bf16.mxu0 %v275_v4  ;;  %203 = vmatprep.mubr.bf16.mxu0 %v42_v12  ;;  %p335_p0 = pnand %p334_p13, %p328_p10 }
  0x24   :  { %249 = vmatpush3.bf16.msra.mxu0 %v276_v5 }
  0x25   :  { %250 = vmatprep.subr.bf16.mxu0 %v277_v6 }
  0x28   :  { %251 = vmatpush3.bf16.msra.mxu0 %v278_v7 }
  0x29   :  { %252 = vmatprep.subr.bf16.mxu0 %v279_v8 }
  0x2c   :  { %253 = vmatpush3.bf16.msra.mxu0 %v280_v9 }
  0x2d   :  { %254 = vmatprep.subr.bf16.mxu0 %v281_v10 }
  0x30   :  { %255 = vmatpush3.bf16.msra.mxu0 %v282_v13 }
  0x31   :  { %256 = vmatprep.subr.bf16.mxu0 %v283_v14 }
  0x34   :  { %257 = vmatpush3.bf16.msra.mxu0 %v284_v15 }
  0x35   :  { %258 = vmatprep.subr.bf16.mxu0 %v285_v16 }
  0x38   :  { %259 = vmatpush3.bf16.msra.mxu0 %v286_v17 }
  0x3b   :  { %204 = vmatmul.mubr.bf16.vlgmr.msra.gmra.mxu0 %v41_v19 }
  0xfb   :  { %v260_v20 = vpop.f32.mrf.mxu0 }
  0xfd   :  { %v261_v21 = vpop.f32.mrf.mxu0 }
  0xfe   :  { %v262_v22 = vadd.f32 %v261_v21, %v260_v20 }
  0xff   :  { %v263_v23 = vpop.f32.mrf.mxu0 }
 0x100   :  { %v206_v24 = vadd.f32 0.125, %v262_v22 }
 0x101   :  { %v264_v25 = vpop.f32.mrf.mxu0 }
 0x102   :  { %211 = vst [vmem:[#allocation7] sm:$0xff] %v206_v24 }
 0x103   :  { %338 = shalt.err (!%p335_p0)
}
 0x104   :  { %221 = dma.vmem_to_hbm [thread:$0]  %s219_s1, 128, %s384_s2, [#allocation4]  }
 0x105   :  { %351 = dma.done.wait [#allocation4], 128  }
 0x106   :  { %352 = vsyncadd [#allocation4], 4294967168 }
 0x107   :  { %225 = vsyncpa [#allocation3], 1 }
 0x108   :  { %226 = vsyncpa [#allocation6], 1 }
 0x109   :  { %227 = vsyncpa [#allocation4], 1 }

</bundles_post_ra>
